<compile_context>
chip_gen: v6e
topology: v6e:2x2x1
jax: 0.10.0
libtpu: 0.0.40
codegen_flags: <defaults>
</compile_context>

<pallas_src>
import functools

import jax
import jax.numpy as jnp
from jax import lax
from jax.experimental import pallas as pl
from jax.experimental.pallas import tpu as pltpu

_KD = 5    # depthwise kernel size
_PAD = 2   # conv padding


@functools.lru_cache(maxsize=None)
def _roll_is_jnp_like() -> bool:
    """Probe pltpu.roll's direction convention once (robust across versions).

    jnp.roll-like means roll(x, +1)[i] == x[i-1]; the kernel needs x[i+d], so
    the shift sign must match whatever the installed lowering does.
    """
    def probe(x_ref, o_ref):
        o_ref[...] = pltpu.roll(x_ref[...], shift=1, axis=1)

    x = lax.broadcasted_iota(jnp.float32, (8, 128), 1)
    y = pl.pallas_call(
        probe, out_shape=jax.ShapeDtypeStruct((8, 128), jnp.float32))(x)
    v = float(y[0, 1])
    if v == 0.0:
        return True       # y[0,1] == x[0,0]: jnp.roll semantics
    if v == 2.0:
        return False      # y[0,1] == x[0,2]: opposite convention
    raise RuntimeError(f"unexpected pltpu.roll behaviour (probe value {v})")


def _pick_pitch(C, W):
    """Per-channel lane pitch P: P >= W + 2*pad and C*P a multiple of 128."""
    need = W + 2 * _PAD
    for k in range(1, 65):
        total = 128 * k
        if total % C == 0 and total // C >= need:
            return total // C
    raise NotImplementedError(
        "TODO(synk): tile W / generalize lane pitch for this (C, W)")


def _make_kernel(nb, H, C, pitch, roll_jnp_like):
    """Fused depthwise5x5 -> ReLU -> pointwise1x1(+bias) -> residual.

    x_ref:   (nb, H+4, C*pitch)  padded, channel-concatenated images (f32)
    dw_ref:  (25, C*pitch)       per-tap depthwise weight lane-vectors
    pw_ref:  (C, C*pitch)        per-roll pointwise weight lane-vectors
    b_ref:   (1, C*pitch)        bias lane-vector
    out_ref: (nb, H, C*pitch)    dense output slabs (valid cols: [0, W) of each
                                 per-channel pitch block)
    """
    L = C * pitch

    def shift_cols(v, d):
        """result[..., i] = v[..., (i + d) % L]  (left shift by d lanes)."""
        d = d % L
        if d == 0:
            return v
        shift = (L - d) if roll_jnp_like else d
        return pltpu.roll(v, shift=shift, axis=1)

    def kernel(x_ref, dw_ref, pw_ref, b_ref, out_ref):
        for m in range(nb):
            acc = None
            xres = None
            # Depthwise 5x5: row taps (ki) = native offset row loads from the
            # VMEM ref; column taps (kj) = XLU lane rolls; all channels at once
            # via per-channel weight lane-vectors (broadcast over sublanes).
            for ki in range(_KD):
                rows = x_ref[m, ki:ki + H, :]                   # (H, L)
                for kj in range(_KD):
                    shifted = shift_cols(rows, kj)
                    if ki == _PAD and kj == _PAD:
                        xres = shifted                          # == x (residual)
                    tap = ki * _KD + kj
                    term = shifted * dw_ref[tap:tap + 1, :]
                    acc = term if acc is None else acc + term
            y = jnp.maximum(acc, 0.0)                           # ReLU
            # Pointwise 1x1 + bias + residual (Identity shortcut), fused:
            # channel mixing = lane roll by multiples of the channel pitch.
            out = xres + b_ref[...]
            for s in range(C):
                out = out + shift_cols(y, s * pitch) * pw_ref[s:s + 1, :]
            out_ref[m] = out.astype(out_ref.dtype)

    return kernel


@functools.partial(jax.jit, static_argnames=("roll_jnp_like",))
def _forward(x_nchw, dw_w, pw_w, pw_b, roll_jnp_like):
    N, C, H, W = x_nchw.shape
    Cout = pw_w.shape[0]
    assert pw_w.shape == (Cout, C)
    # stride=1 path: shortcut is Identity -> residual needs inplane == ouplane.
    assert Cout == C, "stride=1 PDCBlock_convert path needs inplane == ouplane"

    pitch = _pick_pitch(C, W)
    L = C * pitch
    Hp = H + 2 * _PAD

    # Images per grid step: more work per step, but keep >= 2 "parallel" steps
    # so both v7x TensorCores get a share of the batch axis.
    nb = 1
    for cand in (8, 4, 2):
        if N % cand == 0 and N // cand >= 2:
            nb = cand
            break

    f32 = jnp.float32
    # ---- wrapper-side layout plumbing (pure XLA, one-time) -------------------
    # x: (N,C,H,W) -> zero-padded, channel-concatenated lane slab (N, H+4, C*P).
    xq = jnp.pad(x_nchw.astype(f32),
                 ((0, 0), (0, 0), (_PAD, _PAD), (_PAD, pitch - W - _PAD)))
    xq = xq.transpose(0, 2, 1, 3).reshape(N, Hp, L)

    # Depthwise weights -> per-tap lane-vectors: dwv[t, c*P+u] = dw_w[c, t].
    dwv = jnp.broadcast_to(dw_w.astype(f32).T[:, :, None],
                           (_KD * _KD, C, pitch)).reshape(_KD * _KD, L)
    # Pointwise weights -> per-roll lane-vectors: pwv[s, co*P+u] = pw[co,(co+s)%C]
    co = jnp.arange(C)
    g = pw_w.astype(f32)[co[:, None], (co[:, None] + co[None, :]) % C]  # (co, s)
    pwv = jnp.broadcast_to(g.T[:, :, None], (C, C, pitch)).reshape(C, L)
    # Bias lane-vector: bv[0, co*P+u] = pw_b[co].
    bv = jnp.broadcast_to(pw_b.astype(f32)[:, None], (C, pitch)).reshape(1, L)

    kernel = _make_kernel(nb, H, C, pitch, roll_jnp_like)

    flops = N * H * W * C * (2 * _KD * _KD + 2 * C + 3)
    bytes_accessed = 4 * (N * Hp * L + N * H * L + (_KD * _KD + C + 1) * L)

    out_wide = pl.pallas_call(
        kernel,
        out_shape=jax.ShapeDtypeStruct((N, H, L), x_nchw.dtype),
        grid=(N // nb,),
        in_specs=[
            pl.BlockSpec((nb, Hp, L), lambda n: (n, 0, 0)),    # padded images
            pl.BlockSpec((_KD * _KD, L), lambda n: (0, 0)),    # dw lane-vectors
            pl.BlockSpec((C, L), lambda n: (0, 0)),            # pw lane-vectors
            pl.BlockSpec((1, L), lambda n: (0, 0)),            # bias lane-vector
        ],
        out_specs=pl.BlockSpec((nb, H, L), lambda n: (n, 0, 0)),
        compiler_params=pltpu.CompilerParams(
            dimension_semantics=("parallel",),     # batch tiles -> both TCs
            vmem_limit_bytes=32 * 1024 * 1024,     # tiny tiles; safe on 64MiB v7x
        ),
        cost_estimate=pl.CostEstimate(
            flops=flops, transcendentals=0, bytes_accessed=bytes_accessed),
    )(xq, dwv, pwv, bv)

    # (N, H, C*P) -> (N, C, H, W): drop per-channel pad lanes, back to NCHW.
    out = out_wide.reshape(N, H, C, pitch)[:, :, :, :W].transpose(0, 2, 1, 3)
    return out


def pdc_block_convert(x_nchw, dw_w, pw_w, pw_b):
    """PDCBlock_convert forward (stride=1 path). (N,C,H,W) -> (N,C,H,W)."""
    return _forward(x_nchw, dw_w, pw_w, pw_b, roll_jnp_like=_roll_is_jnp_like())


def _reference(x, dw_w, pw_w, pw_b):
    """Pure-JAX reference (lax convs) for correctness check. NCHW in/out."""
    N, C, H, W = x.shape
    xf = x.astype(jnp.float32)
    # depthwise: dw_w (C, 25) -> HWIO (5, 5, 1, C), feature_group_count=C
    k_dw = dw_w.reshape(C, 5, 5).transpose(1, 2, 0)[:, :, None, :].astype(jnp.float32)
    dn = lax.conv_dimension_numbers(xf.shape, k_dw.shape, ('NCHW', 'HWIO', 'NCHW'))
    y = lax.conv_general_dilated(xf, k_dw, window_strides=(1, 1),
                                 padding=((2, 2), (2, 2)),
                                 dimension_numbers=dn,
                                 feature_group_count=C,
                                 precision=lax.Precision.HIGHEST)
    y = jnp.maximum(y, 0.0)
    y = jnp.einsum('nchw,dc->ndhw', y, pw_w.astype(jnp.float32),
                   precision=lax.Precision.HIGHEST)
    y = y + pw_b.astype(jnp.float32)[None, :, None, None]
    return y + xf


if __name__ == "__main__":
    # Small, module-consistent shapes: inplane == ouplane (residual), stride=1.
    N, C, H, W = 2, 4, 16, 16
    Cout = C

    key = jax.random.PRNGKey(0)
    k1, k2, k3, k4 = jax.random.split(key, 4)

    x = jax.random.normal(k1, (N, C, H, W), dtype=jnp.float32)
    # Depthwise conv weight: torch shape (C, 1, 5, 5) -> (C, 25), tap t = ki*5+kj
    dw_torch = jax.random.normal(k2, (C, 1, 5, 5), dtype=jnp.float32) * 0.1
    dw_w = dw_torch[:, 0].reshape(C, 25)
    # Pointwise conv weight: torch shape (Cout, C, 1, 1) -> (Cout, C)
    pw_torch = jax.random.normal(k3, (Cout, C, 1, 1), dtype=jnp.float32) * 0.1
    pw_w = pw_torch[:, :, 0, 0]
    pw_b = jax.random.normal(k4, (Cout,), dtype=jnp.float32) * 0.1

    out = jax.block_until_ready(pdc_block_convert(x, dw_w, pw_w, pw_b))

    ref = _reference(x, dw_w, pw_w, pw_b)
    assert out.shape == (N, Cout, H, W), out.shape
    assert jnp.allclose(out, ref, atol=1e-4, rtol=1e-4), \
        float(jnp.max(jnp.abs(out - ref)))

    print("KERNEL_OK")
</pallas_src>

<mosaic_0001>
module attributes {stable_mosaic.version = 11 : i64} {
  func.func @probe(%arg0: memref<8x128xf32, #tpu.memory_space<vmem>>, %arg1: memref<8x128xf32, #tpu.memory_space<vmem>>) attributes {dimension_semantics = [], scalar_prefetch = 0 : i64, scratch_operands = 0 : i64, tpu.core_type = #tpu.core_type<tc>} {
    %c0 = arith.constant 0 : index
    %c0_0 = arith.constant 0 : index
    %0 = vector.load %arg0[%c0, %c0_0] : memref<8x128xf32, #tpu.memory_space<vmem>>, vector<8x128xf32>
    %c1_i32 = arith.constant 1 : i32
    %1 = tpu.dynamic_rotate %0 by %c1_i32 dim 1 : vector<8x128xf32>, i32 -> vector<8x128xf32>
    %c0_1 = arith.constant 0 : index
    %c0_2 = arith.constant 0 : index
    %2 = vector.load %arg1[%c0_1, %c0_2] : memref<8x128xf32, #tpu.memory_space<vmem>>, vector<8x128xf32>
    tpu.vector_store %arg1[%c0_1, %c0_2], %1 {strides = array<i32>} : memref<8x128xf32, #tpu.memory_space<vmem>>, vector<8x128xf32>,
    return
  }
}

</mosaic_0001>

<bundles_post_ra>
// kernel: tpu_custom_call.1
= control target key start
LH: loop header
LB: loop body
LE: loop exit
PB: predicated region body
PF: predicated region fallthrough
CT: control target
= control target key end

     0   :  { %6 = vsyncpa [#allocation3], 0  ;;  %s106_s0 = inlined_call_operand.hbm [shape: f32[8,128], index: 0, kind: input, shape index: {}]   ;;  %s107_s1 = inlined_call_operand.hbm [shape: f32[8,128], index: 1, kind: output, shape index: {}]  }
   0x1   :  { %7 = vsyncpa [#allocation4], 0  ;;  %s87_s6 = smov [#allocation2]  }
   0x2   :  { %s14_s7 = sshll.u32 %s87_s6, 4  ;;  %s15_s7 = int_to_ptr.vmem [resolvable:$true] %s14_s7 }
   0x3   :  { %s51_s8 = scalar_lea.vmem %s15_s7, 128  ;;  %p56_p1 = scmp.lt.s32.totalorder %s15_s7, %s15_s7 }
   0x4   :  { %p52_p0 = scmp.ne.s32.totalorder %s15_s7, %s51_s8  ;;  %p57_p2 = scmp.lt.s32.totalorder %s51_s8, %s51_s8 }
   0x6   :  { %p58_p3 = por %p57_p2, %p56_p1 }
   0x8   :  { %p59_p4 = pnand %p58_p3, %p52_p0 }
   0xa   :  { %62 = shalt.err (!%p59_p4)
}
   0xb   :  { %17 = dma.hbm_to_vmem [thread:$0]  %s106_s0, 128, %s15_s7, [#allocation3]  }
   0xc   :  { %83 = dma.done.wait [#allocation3], 128  }
   0xd   :  { %84 = vsyncadd [#allocation3], 4294967168  ;;  %v21_v0 = vld [vmem:[#allocation2] sm:$0xff]  ;;  %s88_s11 = smov 1   ;;  %s89_s12 = smov [#allocation5]  }
   0xe   :  { %22 = vrot.lane.b32.xlu0 %v21_v0, %s88_s11  ;;  %s31_s13 = sshll.u32 %s89_s12, 4  ;;  %s32_s13 = int_to_ptr.vmem [resolvable:$true] %s31_s13 }
   0xf   :  { %s63_s14 = scalar_lea.vmem %s32_s13, 128  ;;  %p68_p6 = scmp.lt.s32.totalorder %s32_s13, %s32_s13 }
  0x10   :  { %p64_p5 = scmp.ne.s32.totalorder %s32_s13, %s63_s14  ;;  %p69_p7 = scmp.lt.s32.totalorder %s63_s14, %s63_s14 }
  0x12   :  { %p70_p8 = por %p69_p7, %p68_p6 }
  0x14   :  { %p71_p9 = pnand %p70_p8, %p64_p5 }
  0x80   :  { %v23_v1 = vpop.permute.xlu0 %22 }
  0x81   :  { %24 = vst [vmem:[#allocation5] sm:$0xff] %v23_v1 }
  0x82   :  { %74 = shalt.err (!%p71_p9)
}
  0x83   :  { %34 = dma.vmem_to_hbm [thread:$0]  %s32_s13, 128, %s107_s1, [#allocation4]  }
  0x84   :  { %85 = dma.done.wait [#allocation4], 128  }
  0x85   :  { %86 = vsyncadd [#allocation4], 4294967168 }
  0x86   :  { %38 = vsyncpa [#allocation3], 1 }
  0x87   :  { %39 = vsyncpa [#allocation4], 1 }

</bundles_post_ra>
